<compile_context>
chip_gen: v7x
topology: tpu7x:2x2x1
jax: 0.10.0
libtpu: 0.0.40
codegen_flags: <defaults>
</compile_context>

<pallas_src>
import functools

import jax
import jax.numpy as jnp
from jax.experimental import pallas as pl
from jax.experimental.pallas import tpu as pltpu


def _se_kernel_nch(x_ref, w1t_ref, b1_ref, w2t_ref, b2_ref, o_ref, *, inv_h):
    """Exact per-sample SE on a (Bt, C, H) tile (general path)."""
    x = x_ref[...]                                       # native dtype, never duplicated in f32
    # Squeeze: mean over H; only the reduction path runs in f32.
    squeeze = jnp.sum(x.astype(jnp.float32), axis=2) * inv_h            # (Bt, C)
    # Excitation: tiny MXU matmuls; weights pre-transposed in the wrapper, gate math f32.
    h1 = jnp.maximum(
        jnp.dot(squeeze, w1t_ref[...], preferred_element_type=jnp.float32) + b1_ref[...],
        0.0)
    s = jax.nn.sigmoid(
        jnp.dot(h1, w2t_ref[...], preferred_element_type=jnp.float32) + b2_ref[...])
    # Scale: broadcast the per-(batch, channel) gate along H, multiply in native dtype.
    o_ref[...] = (x * s.astype(x.dtype)[:, :, None]).astype(o_ref.dtype)


def _se_kernel_flat(x_ref, w1t_ref, b1_ref, w2t_ref, b2_ref, pool_ref, expand_ref,
                    o_ref, *, inv_h):
    """Lane-dense SE on a (Bt, C*H) tile (used when H alone would be lane-sparse).

    pool_ref  : (C*H, C) 0/1 matrix  -> segment-sum over each channel's H lanes (MXU).
    expand_ref: (C, C*H) 0/1 matrix  -> broadcast each channel gate across its H lanes.
    Sums accumulate in f32 on the MXU.
    """
    x = x_ref[...]                                                      # (Bt, C*H)
    squeeze = jnp.dot(x, pool_ref[...], preferred_element_type=jnp.float32) * inv_h
    h1 = jnp.maximum(
        jnp.dot(squeeze, w1t_ref[...], preferred_element_type=jnp.float32) + b1_ref[...],
        0.0)
    s = jax.nn.sigmoid(
        jnp.dot(h1, w2t_ref[...], preferred_element_type=jnp.float32) + b2_ref[...])
    gate = jnp.dot(s, expand_ref[...], preferred_element_type=jnp.float32)  # (Bt, C*H)
    o_ref[...] = (x * gate.astype(x.dtype)).astype(o_ref.dtype)


def _round_up(v, m):
    return ((v + m - 1) // m) * m


def channel_se_layer_1d(x, w1, b1, w2, b2, *, block_b=None, flatten_spatial="auto",
                        vmem_limit_bytes=64 * 1024 * 1024):
    """x: (B, C, H); w1: (C_red, C); b1: (C_red,); w2: (C, C_red); b2: (C,)."""
    B, C, H = x.shape
    C_red = w1.shape[0]
    itemsize = x.dtype.itemsize

    # Pre-transpose weights once in the wrapper; keep gate math in f32 (required on v5e).
    w1t = w1.T.astype(jnp.float32)                 # (C, C_red)
    w2t = w2.T.astype(jnp.float32)                 # (C_red, C)
    b1_2d = b1.reshape(1, C_red).astype(jnp.float32)
    b2_2d = b2.reshape(1, C).astype(jnp.float32)

    # Lane-dense layout: flatten (C, H) into the last axis when H is lane-sparse.
    if flatten_spatial == "auto":
        flatten_spatial = (
            H % 128 != 0
            and C * H >= 128
            and C * H * C * itemsize <= 2 * 1024 * 1024   # keep pool/expand tiny
        )

    # Batch-tile sizing: 2 input + 2 output double-buffered tiles kept well under the
    # scoped-VMEM budget on every generation (v7x has only 64 MiB physical VMEM).
    if flatten_spatial:
        bytes_per_sample = C * H * itemsize                       # fully lane-dense
    else:
        bytes_per_sample = C * _round_up(H, 128) * itemsize       # lane padding in VMEM
    if block_b is None:
        budget = 16 * 1024 * 1024
        block_b = max(1, budget // (4 * bytes_per_sample))
    block_b = min(block_b, B)
    if flatten_spatial and block_b < B:
        block_b = max(8, (block_b // 8) * 8)      # sublane-aligned second-minor dim
    grid = (pl.cdiv(B, block_b),)

    cparams = pltpu.CompilerParams(
        dimension_semantics=("parallel",),        # batch tiles shard across TCs on v7x
        vmem_limit_bytes=vmem_limit_bytes,
    )

    weight_specs = [
        pl.BlockSpec((C, C_red), lambda b: (0, 0)),
        pl.BlockSpec((1, C_red), lambda b: (0, 0)),
        pl.BlockSpec((C_red, C), lambda b: (0, 0)),
        pl.BlockSpec((1, C), lambda b: (0, 0)),
    ]

    if flatten_spatial:
        x2 = x.reshape(B, C * H)                  # free wrapper-side reshape (layout plumbing)
        seg = jnp.arange(C * H, dtype=jnp.int32) // H
        ch = jnp.arange(C, dtype=jnp.int32)
        pool = (seg[:, None] == ch[None, :]).astype(x.dtype)        # (C*H, C)
        expand = (ch[:, None] == seg[None, :]).astype(jnp.float32)  # (C, C*H)
        kernel = functools.partial(_se_kernel_flat, inv_h=1.0 / H)
        out2 = pl.pallas_call(
            kernel,
            out_shape=jax.ShapeDtypeStruct((B, C * H), x.dtype),
            grid=grid,
            in_specs=[pl.BlockSpec((block_b, C * H), lambda b: (b, 0))]
            + weight_specs
            + [pl.BlockSpec((C * H, C), lambda b: (0, 0)),
               pl.BlockSpec((C, C * H), lambda b: (0, 0))],
            out_specs=pl.BlockSpec((block_b, C * H), lambda b: (b, 0)),
            compiler_params=cparams,
        )(x2, w1t, b1_2d, w2t, b2_2d, pool, expand)
        return out2.reshape(B, C, H)

    kernel = functools.partial(_se_kernel_nch, inv_h=1.0 / H)
    return pl.pallas_call(
        kernel,
        out_shape=jax.ShapeDtypeStruct((B, C, H), x.dtype),
        grid=grid,
        in_specs=[pl.BlockSpec((block_b, C, H), lambda b: (b, 0, 0))] + weight_specs,
        out_specs=pl.BlockSpec((block_b, C, H), lambda b: (b, 0, 0)),
        compiler_params=cparams,
    )(x, w1t, b1_2d, w2t, b2_2d)


def _reference(x, w1, b1, w2, b2):
    squeeze = jnp.mean(x, axis=2)
    h1 = jnp.maximum(squeeze @ w1.T + b1, 0.0)
    s = jax.nn.sigmoid(h1 @ w2.T + b2)
    return x * s[:, :, None]


if __name__ == "__main__":
    B, C, H = 2, 8, 16
    reduction_ratio = 4
    C_red = C // reduction_ratio

    key = jax.random.PRNGKey(0)
    kx, k1, k2, k3, k4 = jax.random.split(key, 5)

    x = jax.random.normal(kx, (B, C, H), dtype=jnp.float32)
    # Deterministic parameter init (mimics nn.Linear uniform fan-in scaling).
    w1 = jax.random.uniform(k1, (C_red, C), jnp.float32, -1.0, 1.0) / jnp.sqrt(C)
    b1 = jax.random.uniform(k2, (C_red,), jnp.float32, -1.0, 1.0) / jnp.sqrt(C)
    w2 = jax.random.uniform(k3, (C, C_red), jnp.float32, -1.0, 1.0) / jnp.sqrt(C_red)
    b2 = jax.random.uniform(k4, (C,), jnp.float32, -1.0, 1.0) / jnp.sqrt(C_red)

    ref = _reference(x, w1, b1, w2, b2)

    # Exact (B, C, H) path: tight tolerance.
    out_nch = jax.block_until_ready(
        channel_se_layer_1d(x, w1, b1, w2, b2, flatten_spatial=False))
    assert out_nch.shape == (B, C, H)
    assert jnp.allclose(out_nch, ref, atol=1e-5, rtol=1e-5), "nch path mismatch"

    # Lane-dense flat path (auto-selected here since H=16 < 128). Its 0/1 pooling and
    # gate-expand matmuls run on the MXU, whose f32 pass configuration is platform-
    # default dependent, so the check uses a correspondingly looser tolerance.
    out_flat = jax.block_until_ready(channel_se_layer_1d(x, w1, b1, w2, b2))
    assert out_flat.shape == (B, C, H)
    assert jnp.allclose(out_flat, ref, atol=1e-2, rtol=1e-2), "flat path mismatch"

    print("KERNEL_OK")
</pallas_src>

<mosaic_0001>
module attributes {stable_mosaic.version = 11 : i64} {
  func.func @_se_kernel_nch(%arg0: i32, %arg1: memref<2x8x16xf32, #tpu.memory_space<vmem>>, %arg2: memref<8x2xf32, #tpu.memory_space<vmem>>, %arg3: memref<1x2xf32, #tpu.memory_space<vmem>>, %arg4: memref<2x8xf32, #tpu.memory_space<vmem>>, %arg5: memref<1x8xf32, #tpu.memory_space<vmem>>, %arg6: memref<2x8x16xf32, #tpu.memory_space<vmem>>) attributes {dimension_semantics = [#tpu.dimension_semantics<parallel>], iteration_bounds = array<i64: 1>, scalar_prefetch = 0 : i64, scratch_operands = 0 : i64, tpu.core_type = #tpu.core_type<tc>, window_params = [{transform_indices = @transform_0, window_bounds = array<i64: 2, 8, 16>}, {pipeline_mode = #tpu.pipeline_mode<synchronous>, transform_indices = @transform_1, window_bounds = array<i64: 8, 2>}, {pipeline_mode = #tpu.pipeline_mode<synchronous>, transform_indices = @transform_2, window_bounds = array<i64: 1, 2>}, {pipeline_mode = #tpu.pipeline_mode<synchronous>, transform_indices = @transform_3, window_bounds = array<i64: 2, 8>}, {pipeline_mode = #tpu.pipeline_mode<synchronous>, transform_indices = @transform_4, window_bounds = array<i64: 1, 8>}, {transform_indices = @transform_5, window_bounds = array<i64: 2, 8, 16>}]} {
    %c0 = arith.constant 0 : index
    %c0_0 = arith.constant 0 : index
    %c0_1 = arith.constant 0 : index
    %0 = vector.load %arg1[%c0, %c0_0, %c0_1] : memref<2x8x16xf32, #tpu.memory_space<vmem>>, vector<2x8x16xf32>
    %cst = arith.constant dense<0.000000e+00> : vector<2x8xf32>
    %1 = vector.multi_reduction <add>, %0, %cst [2] : vector<2x8x16xf32> to vector<2x8xf32>
    %cst_2 = arith.constant 6.250000e-02 : f32
    %2 = vector.broadcast %cst_2 : f32 to vector<2x8xf32>
    %3 = arith.mulf %1, %2 : vector<2x8xf32>
    %c0_3 = arith.constant 0 : index
    %c0_4 = arith.constant 0 : index
    %4 = vector.load %arg2[%c0_3, %c0_4] : memref<8x2xf32, #tpu.memory_space<vmem>>, vector<8x2xf32>
    %cst_5 = arith.constant dense<0.000000e+00> : vector<2x2xf32>
    %5 = tpu.matmul %3, %4, %cst_5 {dimension_numbers = #tpu.dot_dimension_numbers<[1], [0], [0], [1], [0, 0, 1, 1], [], []>} : vector<2x8xf32>, vector<8x2xf32>, vector<2x2xf32> -> vector<2x2xf32>
    %c0_6 = arith.constant 0 : index
    %c0_7 = arith.constant 0 : index
    %6 = vector.load %arg3[%c0_6, %c0_7] : memref<1x2xf32, #tpu.memory_space<vmem>>, vector<1x2xf32>
    %7 = vector.broadcast %6 : vector<1x2xf32> to vector<2x2xf32>
    %8 = arith.addf %5, %7 : vector<2x2xf32>
    %cst_8 = arith.constant 0.000000e+00 : f32
    %9 = vector.broadcast %cst_8 : f32 to vector<2x2xf32>
    %10 = arith.maximumf %8, %9 : vector<2x2xf32>
    %c0_9 = arith.constant 0 : index
    %c0_10 = arith.constant 0 : index
    %11 = vector.load %arg4[%c0_9, %c0_10] : memref<2x8xf32, #tpu.memory_space<vmem>>, vector<2x8xf32>
    %cst_11 = arith.constant dense<0.000000e+00> : vector<2x8xf32>
    %12 = tpu.matmul %10, %11, %cst_11 {dimension_numbers = #tpu.dot_dimension_numbers<[1], [0], [0], [1], [0, 0, 1, 1], [], []>} : vector<2x2xf32>, vector<2x8xf32>, vector<2x8xf32> -> vector<2x8xf32>
    %c0_12 = arith.constant 0 : index
    %c0_13 = arith.constant 0 : index
    %13 = vector.load %arg5[%c0_12, %c0_13] : memref<1x8xf32, #tpu.memory_space<vmem>>, vector<1x8xf32>
    %14 = vector.broadcast %13 : vector<1x8xf32> to vector<2x8xf32>
    %15 = arith.addf %12, %14 : vector<2x8xf32>
    %16 = arith.negf %15 : vector<2x8xf32>
    %17 = math.exp %16 : vector<2x8xf32>
    %cst_14 = arith.constant 1.000000e+00 : f32
    %18 = vector.broadcast %cst_14 : f32 to vector<2x8xf32>
    %19 = arith.addf %18, %17 : vector<2x8xf32>
    %20 = arith.divf %18, %19 : vector<2x8xf32>
    %21 = vector.shape_cast %20 : vector<2x8xf32> to vector<2x8x1xf32>
    %22 = vector.broadcast %21 : vector<2x8x1xf32> to vector<2x8x16xf32>
    %23 = arith.mulf %0, %22 : vector<2x8x16xf32>
    %c0_15 = arith.constant 0 : index
    %c0_16 = arith.constant 0 : index
    %c0_17 = arith.constant 0 : index
    %24 = vector.load %arg6[%c0_15, %c0_16, %c0_17] : memref<2x8x16xf32, #tpu.memory_space<vmem>>, vector<2x8x16xf32>
    tpu.vector_store %arg6[%c0_15, %c0_16, %c0_17], %23 {strides = array<i32>} : memref<2x8x16xf32, #tpu.memory_space<vmem>>, vector<2x8x16xf32>,
    return
  }
  func.func @transform_0(%arg0: i32) -> (i32, i32, i32) {
    %c0_i32 = arith.constant 0 : i32
    %c0_i32_0 = arith.constant 0 : i32
    %c0_i32_1 = arith.constant 0 : i32
    return %arg0, %c0_i32, %c0_i32_0 : i32, i32, i32
  }
  func.func @transform_1(%arg0: i32) -> (i32, i32) {
    %c0_i32 = arith.constant 0 : i32
    %c0_i32_0 = arith.constant 0 : i32
    %c0_i32_1 = arith.constant 0 : i32
    return %c0_i32, %c0_i32_0 : i32, i32
  }
  func.func @transform_2(%arg0: i32) -> (i32, i32) {
    %c0_i32 = arith.constant 0 : i32
    %c0_i32_0 = arith.constant 0 : i32
    %c0_i32_1 = arith.constant 0 : i32
    return %c0_i32, %c0_i32_0 : i32, i32
  }
  func.func @transform_3(%arg0: i32) -> (i32, i32) {
    %c0_i32 = arith.constant 0 : i32
    %c0_i32_0 = arith.constant 0 : i32
    %c0_i32_1 = arith.constant 0 : i32
    return %c0_i32, %c0_i32_0 : i32, i32
  }
  func.func @transform_4(%arg0: i32) -> (i32, i32) {
    %c0_i32 = arith.constant 0 : i32
    %c0_i32_0 = arith.constant 0 : i32
    %c0_i32_1 = arith.constant 0 : i32
    return %c0_i32, %c0_i32_0 : i32, i32
  }
  func.func @transform_5(%arg0: i32) -> (i32, i32, i32) {
    %c0_i32 = arith.constant 0 : i32
    %c0_i32_0 = arith.constant 0 : i32
    %c0_i32_1 = arith.constant 0 : i32
    return %arg0, %c0_i32, %c0_i32_0 : i32, i32, i32
  }
}

</mosaic_0001>

<bundles_post_ra>
// kernel: tpu_custom_call.1
= control target key start
LH: loop header
LB: loop body
LE: loop exit
PB: predicated region body
PF: predicated region fallthrough
CT: control target
= control target key end

     0   :  { %10 = vsyncpa [#allocation3], 0  ;;  %s613_s0 = inlined_call_operand.hbm [shape: f32[2,8,16], index: 0, kind: input, shape index: {}]   ;;  %s614_s1 = inlined_call_operand.hbm [shape: f32[8,2], index: 1, kind: input, shape index: {}]   ;;  %s615_s2 = inlined_call_operand.hbm [shape: f32[1,2], index: 2, kind: input, shape index: {}]   ;;  %s616_s3 = inlined_call_operand.hbm [shape: f32[2,8], index: 3, kind: input, shape index: {}]   ;;  %s617_s4 = inlined_call_operand.hbm [shape: f32[1,8], index: 4, kind: input, shape index: {}]   ;;  %s618_s5 = inlined_call_operand.hbm [shape: f32[2,8,16], index: 5, kind: output, shape index: {}]  }
   0x1   :  { %11 = vsyncpa [#allocation6], 0 }
   0x2   :  { %12 = vsyncpa [#allocation9], 0 }
   0x3   :  { %13 = vsyncpa [#allocation4], 0  ;;  %s491_s18 = smov [#allocation5]   ;;  %s492_s20 = smov [#allocation8]  }
   0x4   :  { %s32_s19 = sshll.u32 %s491_s18, 4  ;;  %s52_s21 = sshll.u32 %s492_s20, 4  ;;  %s33_s19 = int_to_ptr.vmem [resolvable:$true] %s32_s19  ;;  %s53_s21 = int_to_ptr.vmem [resolvable:$true] %s52_s21 }
   0x5   :  { %s351_s24 = scalar_lea.hbm %s614_s1, 128 }
   0x6   :  { %p352_p0 = scmp.ne.s32.totalorder %s614_s1, %s351_s24  ;;  %p355_p1 = scmp.lt.u32.totalorder %s351_s24, %s614_s1 }
   0x8   :  { %p357_p2 = pnand %p355_p1, %p352_p0 }
   0xa   :  { %360 = shalt.err (!%p357_p2)
}
   0xb   :  { %s361_s29 = scalar_lea.vmem %s33_s19, 128  ;;  %p366_p4 = scmp.lt.s32.totalorder %s33_s19, %s33_s19 }
   0xc   :  { %p362_p3 = scmp.ne.s32.totalorder %s33_s19, %s361_s29  ;;  %p367_p5 = scmp.lt.s32.totalorder %s361_s29, %s361_s29 }
   0xe   :  { %p368_p6 = por %p367_p5, %p366_p4 }
  0x10   :  { %p369_p7 = pnand %p368_p6, %p362_p3 }
  0x12   :  { %372 = shalt.err (!%p369_p7)
}
  0x13   :  { %35 = dma.hbm_to_vmem [thread:$0]  %s614_s1, 128, %s33_s19, [#allocation6]  }
  0x14   :  { %s373_s9 = scalar_lea.hbm %s616_s3, 32 }
  0x15   :  { %p374_p8 = scmp.ne.s32.totalorder %s616_s3, %s373_s9  ;;  %p377_p9 = scmp.lt.u32.totalorder %s373_s9, %s616_s3 }
  0x17   :  { %p379_p10 = pnand %p377_p9, %p374_p8 }
  0x19   :  { %382 = shalt.err (!%p379_p10)
}
  0x1a   :  { %s383_s14 = scalar_lea.vmem %s53_s21, 32  ;;  %p388_p12 = scmp.lt.s32.totalorder %s53_s21, %s53_s21 }
  0x1b   :  { %p384_p11 = scmp.ne.s32.totalorder %s53_s21, %s383_s14  ;;  %p389_p13 = scmp.lt.s32.totalorder %s383_s14, %s383_s14 }
  0x1d   :  { %p390_p0 = por %p389_p13, %p388_p12 }
  0x1f   :  { %p391_p1 = pnand %p390_p0, %p384_p11 }
  0x21   :  { %394 = shalt.err (!%p391_p1)
}
  0x22   :  { %55 = dma.hbm_to_vmem [thread:$0]  %s616_s3, 32, %s53_s21, [#allocation9]  }
  0x23   :  { %s493_s16 = smov [#allocation2]   ;;  %s395_s20 = scalar_lea.hbm %s613_s0, 256 }
  0x24   :  { %s19_s17 = sshll.u32 %s493_s16, 4  ;;  %p396_p2 = scmp.ne.s32.totalorder %s613_s0, %s395_s20  ;;  %s20_s17 = int_to_ptr.vmem [resolvable:$true] %s19_s17 }
  0x25   :  { %p399_p3 = scmp.lt.u32.totalorder %s395_s20, %s613_s0 }
  0x27   :  { %p401_p4 = pnand %p399_p3, %p396_p2 }
  0x29   :  { %404 = shalt.err (!%p401_p4)
}
  0x2a   :  { %s405_s26 = scalar_lea.vmem %s20_s17, 256  ;;  %p410_p6 = scmp.lt.s32.totalorder %s20_s17, %s20_s17 }
  0x2b   :  { %p406_p5 = scmp.ne.s32.totalorder %s20_s17, %s405_s26  ;;  %p411_p7 = scmp.lt.s32.totalorder %s405_s26, %s405_s26 }
  0x2d   :  { %p412_p8 = por %p411_p7, %p410_p6 }
  0x2f   :  { %p413_p9 = pnand %p412_p8, %p406_p5 }
  0x31   :  { %416 = shalt.err (!%p413_p9)
}
  0x32   :  { %s494_s3 = smov 128   ;;  %s495_s21 = smov 8  }
  0x33   :  { %25 = dma.hbm_to_vmem [thread:$0]  %s613_s0, 256, %s20_s17, [#allocation3], %s494_s3, %s494_s3, %s495_s21  }
  0x34   :  { %s496_s29 = smov [#allocation7]   ;;  %s497_s6 = smov [#allocation10]  }
  0x35   :  { %s42_s30 = sshll.u32 %s496_s29, 4  ;;  %s62_s7 = sshll.u32 %s497_s6, 4  ;;  %s43_s30 = int_to_ptr.vmem [resolvable:$true] %s42_s30  ;;  %s63_s7 = int_to_ptr.vmem [resolvable:$true] %s62_s7 }
  0x36   :  { %s417_s10 = scalar_lea.hbm %s615_s2, 16 }
  0x37   :  { %p418_p10 = scmp.ne.s32.totalorder %s615_s2, %s417_s10  ;;  %p421_p11 = scmp.lt.u32.totalorder %s417_s10, %s615_s2 }
  0x39   :  { %p423_p12 = pnand %p421_p11, %p418_p10 }
  0x3b   :  { %426 = shalt.err (!%p423_p12)
}
  0x3c   :  { %s427_s0 = scalar_lea.vmem %s43_s30, 16  ;;  %s431_s1 = scalar_lea.vmem %s43_s30, 32 }
  0x3d   :  { %p428_p13 = scmp.ne.s32.totalorder %s43_s30, %s427_s0  ;;  %p432_p0 = scmp.lt.s32.totalorder %s43_s30, %s43_s30 }
  0x3e   :  { %p433_p1 = scmp.lt.s32.totalorder %s431_s1, %s427_s0 }
  0x40   :  { %p434_p2 = por %p433_p1, %p432_p0 }
  0x42   :  { %p435_p3 = pnand %p434_p2, %p428_p13 }
  0x44   :  { %438 = shalt.err (!%p435_p3)
}
  0x45   :  { %45 = dma.hbm_to_vmem [thread:$0]  %s615_s2, 16, %s43_s30, [#allocation6]  }
  0x46   :  { %s439_s19 = scalar_lea.hbm %s617_s4, 16 }
  0x47   :  { %p440_p4 = scmp.ne.s32.totalorder %s617_s4, %s439_s19  ;;  %p443_p5 = scmp.lt.u32.totalorder %s439_s19, %s617_s4 }
  0x49   :  { %p445_p6 = pnand %p443_p5, %p440_p4 }
  0x4b   :  { %448 = shalt.err (!%p445_p6)
}
  0x4c   :  { %s449_s25 = scalar_lea.vmem %s63_s7, 16  ;;  %s453_s26 = scalar_lea.vmem %s63_s7, 32 }
  0x4d   :  { %p450_p7 = scmp.ne.s32.totalorder %s63_s7, %s449_s25  ;;  %p454_p8 = scmp.lt.s32.totalorder %s63_s7, %s63_s7 }
  0x4e   :  { %p455_p9 = scmp.lt.s32.totalorder %s453_s26, %s449_s25 }
  0x50   :  { %p456_p10 = por %p455_p9, %p454_p8 }
  0x52   :  { %p457_p11 = pnand %p456_p10, %p450_p7 }
  0x54   :  { %460 = shalt.err (!%p457_p11)
}
  0x55   :  { %65 = dma.hbm_to_vmem [thread:$0]  %s617_s4, 16, %s63_s7, [#allocation9]  }
  0x56   :  { %483 = dma.done.wait [#allocation3], 256  }
  0x57   :  { %484 = vsyncadd [#allocation3], 4294967040 }
  0x58   :  { %485 = dma.done.wait [#allocation6], 144  }
  0x59   :  { %486 = vsyncadd [#allocation6], 4294967152 }
  0x5a   :  { %487 = dma.done.wait [#allocation9], 48  }
  0x5b   :  { %488 = vsyncadd [#allocation9], 4294967248  ;;  %vm83_vm0 = vcmask 130048   ;;  %v81_v0 = vld [vmem:[#allocation2] sm:$0xff]  ;;  %v82_v1 = vld [vmem:[#allocation2 + $0x8] sm:$0xff]  ;;  %v498_v5 = vmov 0.0   ;;  %v102_v6 = vlaneseq }
  0x5c   :  { %v84_v2 = vsel %vm83_vm0, %v81_v0, 0.0  ;;  %v87_v3 = vsel %vm83_vm0, %v82_v1, 0.0  ;;  %v92_v4 = vld [vmem:[#allocation5] sm:$0xff]  ;;  %327 = vmatprep.subr.mxu0 %v498_v5  ;;  %vm499_vm1 = vmmov 0   ;;  %332 = vmatprep.subr.mxu1 %v498_v5  ;;  %vm112_vm2 = vcmask 1041409   ;;  %s500_s4 = smov [#allocation11]  }
  0x5d   :  { %85 = vadd.xlane.f32.xlu0 %v84_v2  ;;  %329 = vmatprep.mubr.msk.f32.mxu0 %vm499_vm1, %v498_v5  ;;  %v103_v7 = vand.u32 127, %v102_v6  ;;  %v105_v8 = vshrl.u32 %v102_v6, 7  ;;  %vm114_vm3 = vcmask 64512   ;;  %v188_v17 = vld [vmem:[#allocation8] sm:$0x3]  ;;  %vm200_vm4 = vcmask 1041408  }
  0x5e   :  { %328 = vmatpush3.msra.mxu0 %v92_v4  ;;  %334 = vmatprep.mubr.msk.f32.mxu1 %vm499_vm1, %v498_v5  ;;  %v317_v18 = vld [vmem:[#allocation7] ss:$0 sm:$0xff]  ;;  %vm196_vm5 = vcmask 15360   ;;  %v319_v23 = vld [vmem:[#allocation10] ss:$0 sm:$0xff]  ;;  %s303_s28 = sshll.u32 %s500_s4, 4  ;;  %s304_s28 = int_to_ptr.vmem [resolvable:$true] %s303_s28 }
  0x5f   :  { %v106_v10 = vsub.s32 %v103_v7, %v105_v8  ;;  %333 = vmatpush3.msk.msra.mxu1 %vm200_vm4, %v188_v17  ;;  %v282_v30 = vsub.s32 0, %v105_v8  ;;  %v289_v33 = vsub.s32 1, %v105_v8  ;;  %s461_s29 = scalar_lea.vmem %s304_s28, 256  ;;  %p466_p13 = scmp.lt.s32.totalorder %s304_s28, %s304_s28 }
  0x60   :  { %p462_p12 = scmp.ne.s32.totalorder %s304_s28, %s461_s29  ;;  %p467_p0 = scmp.lt.s32.totalorder %s461_s29, %s461_s29 }
  0x61   :  { %88 = vadd.xlane.f32.xlu0 %v87_v3 }
  0x62   :  { %p468_p1 = por %p467_p0, %p466_p13 }
  0x64   :  { %p469_p2 = pnand %p468_p1, %p462_p12 }
  0xea   :  { %v86_v9 = vpop.xlane.xlu0 %85 }
  0xeb   :  { %v90_v11 = vmul.f32 0.0625, %v86_v9 }
  0xed   :  { %v107_v14 = vrot.slane %v90_v11, %v106_v10 }
  0xee   :  { %v89_v12 = vpop.xlane.xlu0 %88 }
  0xef   :  { %v91_v13 = vmul.f32 0.0625, %v89_v12 }
  0xf1   :  { %v111_v15 = vrot.slane %v91_v13, %v106_v10 }
  0xf3   :  { %v113_v16 = vsel %vm112_vm2, %v111_v15, %v107_v14 }
  0xf4   :  { %330 = vmatmul.mubr.msk.f32.vlgmr.msra.gmra.mrb[0].mxu0 %vm114_vm3, %v113_v16 }
 0x1c7   :  { %v183_v19 = vpop.f32.mrb[0].mxu0 }
 0x1c8   :  { %v184_v20 = vadd.f32 %v317_v18, %v183_v19  ;;  %v331_v21 = vpop.f32.mrb[1].mxu0 }
 0x1ca   :  { %v187_v22 = vmax.f32 %v184_v20, 0.0 }
 0x1cc   :  { %335 = vmatmul.mubr.msk.f32.vlgmr.msra.gmra.mrb[0].mxu1 %vm196_vm5, %v187_v22 }
 0x29f   :  { %v270_v24 = vpop.f32.mrb[0].mxu1 }
 0x2a0   :  { %v271_v25 = vadd.f32 %v319_v23, %v270_v24  ;;  %v336_v26 = vpop.f32.mrb[1].mxu1 }
 0x2a2   :  { %v322_v27 = vmul.f32 -1.442695, %v271_v25 }
 0x2a4   :  { %347 = vpow2.f32 %v322_v27 }
 0x2ae   :  { %v348_v28 = vpop.eup %347 }
 0x2af   :  { %v277_v29 = vadd.f32 1.0, %v348_v28 }
 0x2b1   :  { %349 = vrcp.f32 %v277_v29 }
 0x2bb   :  { %v350_v31 = vpop.eup %349 }
 0x2bc   :  { %v283_v32 = vrot.slane %v350_v31, %v282_v30  ;;  %v290_v34 = vrot.slane %v350_v31, %v289_v33 }
 0x2be   :  { %285 = vbcast.lane.b32.xlu1 %v283_v32, 256 }
 0x2c2   :  { %292 = vbcast.lane.b32.xlu1 %v290_v34, 256 }
 0x330   :  { %v286_v35 = vpop.permute.xlu1 %285 }
 0x331   :  { %v294_v36 = vmul.f32 %v286_v35, %v81_v0 }
 0x333   :  { %296 = vst.msk [vmem:[#allocation11] sm:$0xff] %vm83_vm0, %v294_v36 }
 0x334   :  { %v293_v37 = vpop.permute.xlu1 %292 }
 0x335   :  { %v295_v38 = vmul.f32 %v293_v37, %v82_v1 }
 0x337   :  { %297 = vst.msk [vmem:[#allocation11 + $0x8] sm:$0xff] %vm83_vm0, %v295_v38 }
 0x338   :  { %472 = shalt.err (!%p469_p2)
}
 0x339   :  { %s473_s7 = scalar_lea.hbm %s618_s5, 256 }
 0x33a   :  { %p474_p3 = scmp.ne.s32.totalorder %s618_s5, %s473_s7  ;;  %p477_p4 = scmp.lt.u32.totalorder %s473_s7, %s618_s5 }
 0x33c   :  { %p479_p5 = pnand %p477_p4, %p474_p3 }
 0x33e   :  { %482 = shalt.err (!%p479_p5)
}
 0x33f   :  { %309 = dma.vmem_to_hbm [thread:$0]  %s304_s28, 256, %s618_s5, [#allocation4], %s494_s3, %s494_s3, %s495_s21  }
 0x340   :  { %489 = dma.done.wait [#allocation4], 256  }
 0x341   :  { %490 = vsyncadd [#allocation4], 4294967040 }
 0x342   :  { %313 = vsyncpa [#allocation3], 1 }
 0x343   :  { %314 = vsyncpa [#allocation6], 1 }
 0x344   :  { %315 = vsyncpa [#allocation9], 1 }
 0x345   :  { %316 = vsyncpa [#allocation4], 1 }

</bundles_post_ra>
